<compile_context>
chip_gen: v6e
topology: v6e:2x2x1
jax: 0.10.0
libtpu: 0.0.40
codegen_flags: <defaults>
</compile_context>

<pallas_src>
from functools import partial

import jax
import jax.numpy as jnp
from jax.experimental import pallas as pl
from jax.experimental.pallas import tpu as pltpu


def _residual_kernel(x_ref, wfg_ref, bfg_ref, wsr_ref, bsr_ref,
                     res_ref, skip_ref, *, R, S):
    # x block: (C_in, tile_t)  -- time on the lane axis.
    x = x_ref[...].astype(jnp.float32)

    # Fused filter+gate conv: (2R, C_in) @ (C_in, tile_t) -> (2R, tile_t)
    fg = jnp.dot(wfg_ref[...], x, preferred_element_type=jnp.float32) + bfg_ref[...]
    z = jnp.tanh(fg[:R]) * jax.nn.sigmoid(fg[R:])                 # (R, tile_t)

    # Fused skip+residual conv: (S + C_in, R) @ (R, tile_t) -> (S + C_in, tile_t)
    sr = jnp.dot(wsr_ref[...], z, preferred_element_type=jnp.float32) + bsr_ref[...]

    skip_ref[...] = sr[:S].astype(skip_ref.dtype)                 # (S, tile_t)
    res_ref[...] = (sr[S:] + x).astype(res_ref.dtype)             # (C_in, tile_t)


def residual_block(x, params, *, tile_t=256):
    """x: (B, C_in, T)  ->  (residual (B, C_in, T), skip (B, S, T)).

    params: (wf, bf, wg, bg, wr, br, ws, bs) with weights in PyTorch conv
    layout (C_out, C_in) and biases (C_out,).
    """
    wf, bf, wg, bg, wr, br, ws, bs = params
    B, C_in, T = x.shape
    R = wf.shape[0]
    S = ws.shape[0]

    # Pack weights once in the wrapper (trace-time concat, negligible cost).
    wfg = jnp.concatenate([wf, wg], axis=0)                        # (2R, C_in)
    bfg = jnp.concatenate([bf, bg], axis=0).reshape(2 * R, 1)      # (2R, 1)
    wsr = jnp.concatenate([ws, wr], axis=0)                        # (S + C_in, R)
    bsr = jnp.concatenate([bs, br], axis=0).reshape(S + C_in, 1)   # (S + C_in, 1)

    # Keep tile_t a multiple of 128 for lane-dense stores; fall back to one
    # full-T tile for ragged sequence lengths (still correct, just less tiled).
    if T < tile_t or T % tile_t != 0:
        tile_t = T

    grid = (B, T // tile_t)
    const = lambda shape: pl.BlockSpec(shape, lambda b, t: (0, 0))

    kernel = partial(_residual_kernel, R=R, S=S)

    residual, skip = pl.pallas_call(
        kernel,
        out_shape=(
            jax.ShapeDtypeStruct((B, C_in, T), x.dtype),
            jax.ShapeDtypeStruct((B, S, T), x.dtype),
        ),
        grid=grid,
        in_specs=[
            pl.BlockSpec((None, C_in, tile_t), lambda b, t: (b, 0, t)),  # x tile
            const((2 * R, C_in)), const((2 * R, 1)),                     # fused fil|gate
            const((S + C_in, R)), const((S + C_in, 1)),                  # fused skip|res
        ],
        out_specs=(
            pl.BlockSpec((None, C_in, tile_t), lambda b, t: (b, 0, t)),
            pl.BlockSpec((None, S, tile_t), lambda b, t: (b, 0, t)),
        ),
        compiler_params=pltpu.CompilerParams(
            # Every grid point is independent -> both axes parallel so Mosaic
            # can shard across v7x's 2 TensorCores.  VMEM per step is
            # ~2 bufs * tile_t * (2*C_in + S) * 4B + weights, far under the
            # scoped default at these channel counts.
            dimension_semantics=("parallel", "parallel")),
    )(x, wfg, bfg, wsr, bsr)

    return residual, skip


def init_params(key, in_channels, residual_channels, skip_channels):
    """Deterministic synthetic weights in PyTorch conv layout (C_out, C_in)."""
    ks = jax.random.split(key, 8)
    scale = 0.1
    wf = jax.random.normal(ks[0], (residual_channels, in_channels), jnp.float32) * scale
    bf = jax.random.normal(ks[1], (residual_channels,), jnp.float32) * scale
    wg = jax.random.normal(ks[2], (residual_channels, in_channels), jnp.float32) * scale
    bg = jax.random.normal(ks[3], (residual_channels,), jnp.float32) * scale
    wr = jax.random.normal(ks[4], (in_channels, residual_channels), jnp.float32) * scale
    br = jax.random.normal(ks[5], (in_channels,), jnp.float32) * scale
    ws = jax.random.normal(ks[6], (skip_channels, residual_channels), jnp.float32) * scale
    bs = jax.random.normal(ks[7], (skip_channels,), jnp.float32) * scale
    return (wf, bf, wg, bg, wr, br, ws, bs)


def _reference(x, params):
    wf, bf, wg, bg, wr, br, ws, bs = params
    # plain-JAX reference in NCW layout; weights (C_out, C_in)
    def conv1x1(inp, w, b):
        return jnp.einsum('bct,dc->bdt', inp, w) + b.reshape(1, -1, 1)
    fil = jnp.tanh(conv1x1(x, wf, bf))
    gate = jax.nn.sigmoid(conv1x1(x, wg, bg))
    z = fil * gate
    skip = conv1x1(z, ws, bs)
    residual = conv1x1(z, wr, br) + x
    return residual, skip


if __name__ == "__main__":
    B, C_in, T = 2, 16, 512         # batch, in_channels, sequence length
    R, S = 32, 64                   # residual_channels, skip_channels

    key = jax.random.PRNGKey(0)
    kx, kp = jax.random.split(key)
    x = jax.random.normal(kx, (B, C_in, T), jnp.float32)
    params = init_params(kp, C_in, R, S)

    residual, skip = jax.block_until_ready(residual_block(x, params))

    res_ref, skip_ref = _reference(x, params)
    assert residual.shape == (B, C_in, T) and skip.shape == (B, S, T)
    assert jnp.allclose(residual, res_ref, atol=1e-5, rtol=1e-5)
    assert jnp.allclose(skip, skip_ref, atol=1e-5, rtol=1e-5)

    print("KERNEL_OK")
</pallas_src>

<mosaic_0001>
module attributes {stable_mosaic.version = 11 : i64} {
  func.func @_residual_kernel(%arg0: i32, %arg1: i32, %arg2: memref<1x16x256xf32, #tpu.memory_space<vmem>>, %arg3: memref<64x16xf32, #tpu.memory_space<vmem>>, %arg4: memref<64x1xf32, #tpu.memory_space<vmem>>, %arg5: memref<80x32xf32, #tpu.memory_space<vmem>>, %arg6: memref<80x1xf32, #tpu.memory_space<vmem>>, %arg7: memref<1x16x256xf32, #tpu.memory_space<vmem>>, %arg8: memref<1x64x256xf32, #tpu.memory_space<vmem>>) attributes {dimension_semantics = [#tpu.dimension_semantics<parallel>, #tpu.dimension_semantics<parallel>], iteration_bounds = array<i64: 2, 2>, scalar_prefetch = 0 : i64, scratch_operands = 0 : i64, tpu.core_type = #tpu.core_type<tc>, window_params = [{transform_indices = @transform_0, window_bounds = array<i64: 1, 16, 256>}, {pipeline_mode = #tpu.pipeline_mode<synchronous>, transform_indices = @transform_1, window_bounds = array<i64: 64, 16>}, {pipeline_mode = #tpu.pipeline_mode<synchronous>, transform_indices = @transform_2, window_bounds = array<i64: 64, 1>}, {pipeline_mode = #tpu.pipeline_mode<synchronous>, transform_indices = @transform_3, window_bounds = array<i64: 80, 32>}, {pipeline_mode = #tpu.pipeline_mode<synchronous>, transform_indices = @transform_4, window_bounds = array<i64: 80, 1>}, {transform_indices = @transform_5, window_bounds = array<i64: 1, 16, 256>}, {transform_indices = @transform_6, window_bounds = array<i64: 1, 64, 256>}]} {
    %c0 = arith.constant 0 : index
    %c0_0 = arith.constant 0 : index
    %c0_1 = arith.constant 0 : index
    %0 = vector.load %arg2[%c0, %c0_0, %c0_1] : memref<1x16x256xf32, #tpu.memory_space<vmem>>, vector<1x16x256xf32>
    %1 = vector.shape_cast %0 : vector<1x16x256xf32> to vector<16x256xf32>
    %c0_2 = arith.constant 0 : index
    %c0_3 = arith.constant 0 : index
    %2 = vector.load %arg3[%c0_2, %c0_3] : memref<64x16xf32, #tpu.memory_space<vmem>>, vector<64x16xf32>
    %cst = arith.constant dense<0.000000e+00> : vector<64x256xf32>
    %3 = tpu.matmul %2, %1, %cst {dimension_numbers = #tpu.dot_dimension_numbers<[1], [0], [0], [1], [0, 0, 1, 1], [], []>} : vector<64x16xf32>, vector<16x256xf32>, vector<64x256xf32> -> vector<64x256xf32>
    %c0_4 = arith.constant 0 : index
    %c0_5 = arith.constant 0 : index
    %4 = vector.load %arg4[%c0_4, %c0_5] : memref<64x1xf32, #tpu.memory_space<vmem>>, vector<64x1xf32>
    %5 = vector.broadcast %4 : vector<64x1xf32> to vector<64x256xf32>
    %6 = arith.addf %3, %5 : vector<64x256xf32>
    %7 = vector.extract_strided_slice %6 {offsets = [0, 0], sizes = [32, 256], strides = [1, 1]} : vector<64x256xf32> to vector<32x256xf32>
    %8 = math.tanh %7 : vector<32x256xf32>
    %9 = vector.extract_strided_slice %6 {offsets = [32, 0], sizes = [32, 256], strides = [1, 1]} : vector<64x256xf32> to vector<32x256xf32>
    %10 = arith.negf %9 : vector<32x256xf32>
    %11 = math.exp %10 : vector<32x256xf32>
    %cst_6 = arith.constant 1.000000e+00 : f32
    %12 = vector.broadcast %cst_6 : f32 to vector<32x256xf32>
    %13 = arith.addf %12, %11 : vector<32x256xf32>
    %14 = arith.divf %12, %13 : vector<32x256xf32>
    %15 = arith.mulf %8, %14 : vector<32x256xf32>
    %c0_7 = arith.constant 0 : index
    %c0_8 = arith.constant 0 : index
    %16 = vector.load %arg5[%c0_7, %c0_8] : memref<80x32xf32, #tpu.memory_space<vmem>>, vector<80x32xf32>
    %cst_9 = arith.constant dense<0.000000e+00> : vector<80x256xf32>
    %17 = tpu.matmul %16, %15, %cst_9 {dimension_numbers = #tpu.dot_dimension_numbers<[1], [0], [0], [1], [0, 0, 1, 1], [], []>} : vector<80x32xf32>, vector<32x256xf32>, vector<80x256xf32> -> vector<80x256xf32>
    %c0_10 = arith.constant 0 : index
    %c0_11 = arith.constant 0 : index
    %18 = vector.load %arg6[%c0_10, %c0_11] : memref<80x1xf32, #tpu.memory_space<vmem>>, vector<80x1xf32>
    %19 = vector.broadcast %18 : vector<80x1xf32> to vector<80x256xf32>
    %20 = arith.addf %17, %19 : vector<80x256xf32>
    %21 = vector.extract_strided_slice %20 {offsets = [0, 0], sizes = [64, 256], strides = [1, 1]} : vector<80x256xf32> to vector<64x256xf32>
    %c0_12 = arith.constant 0 : index
    %c0_13 = arith.constant 0 : index
    %c0_14 = arith.constant 0 : index
    %22 = vector.load %arg8[%c0_12, %c0_13, %c0_14] : memref<1x64x256xf32, #tpu.memory_space<vmem>>, vector<1x64x256xf32>
    %23 = vector.shape_cast %22 : vector<1x64x256xf32> to vector<64x256xf32>
    %24 = vector.shape_cast %21 : vector<64x256xf32> to vector<1x64x256xf32>
    tpu.vector_store %arg8[%c0_12, %c0_13, %c0_14], %24 {strides = array<i32>} : memref<1x64x256xf32, #tpu.memory_space<vmem>>, vector<1x64x256xf32>,
    %25 = vector.extract_strided_slice %20 {offsets = [64, 0], sizes = [16, 256], strides = [1, 1]} : vector<80x256xf32> to vector<16x256xf32>
    %26 = arith.addf %25, %1 : vector<16x256xf32>
    %c0_15 = arith.constant 0 : index
    %c0_16 = arith.constant 0 : index
    %c0_17 = arith.constant 0 : index
    %27 = vector.load %arg7[%c0_15, %c0_16, %c0_17] : memref<1x16x256xf32, #tpu.memory_space<vmem>>, vector<1x16x256xf32>
    %28 = vector.shape_cast %27 : vector<1x16x256xf32> to vector<16x256xf32>
    %29 = vector.shape_cast %26 : vector<16x256xf32> to vector<1x16x256xf32>
    tpu.vector_store %arg7[%c0_15, %c0_16, %c0_17], %29 {strides = array<i32>} : memref<1x16x256xf32, #tpu.memory_space<vmem>>, vector<1x16x256xf32>,
    return
  }
  func.func @transform_0(%arg0: i32, %arg1: i32) -> (i32, i32, i32) {
    %c0_i32 = arith.constant 0 : i32
    %c0_i32_0 = arith.constant 0 : i32
    return %arg0, %c0_i32, %arg1 : i32, i32, i32
  }
  func.func @transform_1(%arg0: i32, %arg1: i32) -> (i32, i32) {
    %c0_i32 = arith.constant 0 : i32
    %c0_i32_0 = arith.constant 0 : i32
    %c0_i32_1 = arith.constant 0 : i32
    return %c0_i32, %c0_i32_0 : i32, i32
  }
  func.func @transform_2(%arg0: i32, %arg1: i32) -> (i32, i32) {
    %c0_i32 = arith.constant 0 : i32
    %c0_i32_0 = arith.constant 0 : i32
    %c0_i32_1 = arith.constant 0 : i32
    return %c0_i32, %c0_i32_0 : i32, i32
  }
  func.func @transform_3(%arg0: i32, %arg1: i32) -> (i32, i32) {
    %c0_i32 = arith.constant 0 : i32
    %c0_i32_0 = arith.constant 0 : i32
    %c0_i32_1 = arith.constant 0 : i32
    return %c0_i32, %c0_i32_0 : i32, i32
  }
  func.func @transform_4(%arg0: i32, %arg1: i32) -> (i32, i32) {
    %c0_i32 = arith.constant 0 : i32
    %c0_i32_0 = arith.constant 0 : i32
    %c0_i32_1 = arith.constant 0 : i32
    return %c0_i32, %c0_i32_0 : i32, i32
  }
  func.func @transform_5(%arg0: i32, %arg1: i32) -> (i32, i32, i32) {
    %c0_i32 = arith.constant 0 : i32
    %c0_i32_0 = arith.constant 0 : i32
    return %arg0, %c0_i32, %arg1 : i32, i32, i32
  }
  func.func @transform_6(%arg0: i32, %arg1: i32) -> (i32, i32, i32) {
    %c0_i32 = arith.constant 0 : i32
    %c0_i32_0 = arith.constant 0 : i32
    return %arg0, %c0_i32, %arg1 : i32, i32, i32
  }
}

</mosaic_0001>

<bundles_post_ra>
// kernel: tpu_custom_call.1
= control target key start
LH: loop header
LB: loop body
LE: loop exit
PB: predicated region body
PF: predicated region fallthrough
CT: control target
= control target key end

     0   :  { %s1722_s0 = inlined_call_operand.vmem [shape: f32[2,16,512], index: 0, kind: input, shape index: {}]   ;;  %s1723_s1 = inlined_call_operand.vmem [shape: f32[64,16], index: 1, kind: input, shape index: {}]   ;;  %s1724_s2 = inlined_call_operand.vmem [shape: f32[64,1], index: 2, kind: input, shape index: {}]   ;;  %s1725_s3 = inlined_call_operand.vmem [shape: f32[80,32], index: 3, kind: input, shape index: {}]   ;;  %s1726_s4 = inlined_call_operand.vmem [shape: f32[80,1], index: 4, kind: input, shape index: {}]   ;;  %s1727_s5 = inlined_call_operand.hbm [shape: f32[2,16,512], index: 5, kind: output, shape index: {0}]   ;;  %s1728_s6 = inlined_call_operand.hbm [shape: f32[2,64,512], index: 6, kind: output, shape index: {1}]  }
   0x1   :  { %1731 = sst [smem:[#allocation9_spill]] %s1722_s0 }
   0x2   :  { %1732 = sst [smem:[#allocation10_spill]] %s1723_s1 }
   0x3   :  { %12 = vsyncpa [#allocation4], 0 }
   0x4   :  { %14 = vsyncpa [#allocation4 + $0x1], 0 }
   0x5   :  { %15 = vsyncpa [#allocation6], 0 }
   0x6   :  { %17 = vsyncpa [#allocation6 + $0x1], 0  ;;  %s1334_s21 = smov 0   ;;  %s1336_s22 = smov 0  }
   0x7   :  { %s1338_s23 = smov 0   ;;  %s1340_s24 = smov 0  }
   0x8   :  { %s1342_s25 = smov 0   ;;  %s1344_s26 = smov 0  }
   0x9   :  { %s1346_s27 = smov 0   ;;  %s1348_s28 = smov 0  }
   0xa LB: > { %s981_s29 = sadd.s32 4294967295, %s1290_s28   ;;  %s982_s30 = sadd.s32 4294967294, %s1290_s28   ;;  %s1290_s28 = sphi %s1348_s28, %s23_s28   ;;  %s1286_s27 = sphi %s1346_s27, %s1748_s27   ;;  %s1282_s26 = sphi %s1344_s26, %s1747_s26   ;;  %s1278_s25 = sphi %s1342_s25, %s1746_s25   ;;  %s1274_s24 = sphi %s1340_s24, %s1745_s24   ;;  %s1270_s23 = sphi %s1338_s23, %s1744_s23   ;;  %s1266_s22 = sphi %s1336_s22, %s1743_s22   ;;  %s1262_s21 = sphi %s1334_s21, %s1742_s21  }
   0xb   : > { %s32_s7 = sadd.s32 1, %s1282_s26  ;;  %s35_s8 = sadd.s32 1, %s1286_s27 }
   0xc   : > { %p33_p0 = scmp.ge.s32.totalorder %s32_s7, 2  ;;  %p51_p1 = scmp.ne.s32.totalorder %s1270_s23, %s1266_s22 }
   0xd   : > { %p52_p2 = scmp.eq.s32.totalorder %s1290_s28, 0  ;;  %p167_p5 = scmp.eq.s32.totalorder %s981_s29, 3 }
   0xe   : > { %s1750_s7 = smov (%p33_p0, %s32_s7), 0  ;;  %s1752_s8 = smov (!%p33_p0, %s35_s8), %s1286_s27 }
   0xf   : > { %s40_s9 = ssub.s32 %s1282_s26, %s1750_s7  ;;  %p1386_p3 = por %p52_p2, %p51_p1 }
  0x10   : > { %p37_p4 = scmp.ge.s32.totalorder %s1752_s8, 2  ;;  %p172_p6 = scmp.ne.s32.totalorder %s1266_s22, %s1262_s21 }
  0x11   : > { %p173_p7 = scmp.eq.s32.totalorder %s982_s30, 3  ;;  %p1394_p8 = por %p167_p5, %p51_p1 }
  0x12   : > { %s1754_s8 = smov (%p37_p4, %s1752_s8), 0  ;;  %s44_s15 = sadd.s32 1, %s1270_s23 }
  0x13   : > { %p1398_p9 = por %p173_p7, %p172_p6  ;;  %s39_s13 = ssub.s32 %s1286_s27, %s1754_s8 }
  0x14   : > { %s41_s14 = sor.u32 %s40_s9, %s39_s13  ;;  %p984_p11 = scmp.ge.s32.totalorder %s1290_s28, 4 }
  0x15   : > { %p42_p10 = scmp.eq.s32.totalorder %s41_s14, 0 }
  0x16   : > { %229 = sbr.rel (%p984_p11) target bundleno = 39 (0x27), region = 32 }
  0x17   : > { %s1406_s16 = scalar_select %p42_p10, %s1270_s23, %s44_s15  }
  0x1b   : > { %232 = sbr.rel (!%p1386_p3) target bundleno = 39 (0x27), region = 36  ;;  %s234_s17 = sand.u32 (%p1386_p3), 1, %s1270_s23  }
  0x1c   : > { %s986_s18 = sshll.u32 (%p1386_p3), %s1282_s26, 1  ;;  %s985_s19 = sshll.u32 (%p1386_p3), %s234_s17, 5 }
  0x1d   : > { %s987_s20 = sshll.u32 (%p1386_p3), %s1286_s27, 3  ;;  %s1736_s0 = sld [smem:[#allocation9_spill]] (%p1386_p3) }
  0x1e   : > { %s239_s29 = sadd.s32 (%p1386_p3), %s987_s20, %s986_s18  ;;  %s236_s15 = scalar_lea.vmem (%p1386_p3), [#allocation2], %s985_s19 }
  0x1f   : > { %s988_s30 = sshll.u32 (%p1386_p3), %s239_s29, 3 }
  0x23   : > { %s241_s14 = scalar_lea.vmem %s1736_s0, %s988_s30 }
  0x24   : > { %v254_v0 = vld [vmem:[%s241_s14] sm:$0xff]  ;;  %v256_v1 = vld [vmem:[%s241_s14 + $0x8] sm:$0xff] }
  0x25   : > { %v258_v2 = vld [vmem:[%s241_s14 + $0x20] sm:$0xff]  ;;  %255 = vst [vmem:[%s236_s15] sm:$0xff] %v254_v0  ;;  %257 = vst [vmem:[%s236_s15 + $0x8] sm:$0xff] %v256_v1  ;;  %v260_v3 = vld [vmem:[%s241_s14 + $0x28] sm:$0xff] }
  0x26   : > { %259 = vst [vmem:[%s236_s15 + $0x10] sm:$0xff] %v258_v2  ;;  %261 = vst [vmem:[%s236_s15 + $0x18] sm:$0xff] %v260_v3 }
  0x27 PF: > { %p989_p12 = scmp.ge.s32.totalorder %s1290_s28, 1  ;;  %p266_p13 = scmp.lt.s32.totalorder %s1290_s28, 5 }
  0x29   : > { %p267_p0 = pnand %p989_p12, %p266_p13 }
  0x2a   : > { %s1420_s10 = sand.u32 (!%p267_p0), 1, %s1266_s22   ;;  %s1737_s1 = sld [smem:[#allocation10_spill]] (!%p267_p0) }
  0x2b   : > { %270 = sbr.rel (%p267_p0) target bundleno = 585 (0x249), region = 59  ;;  %s1729_s17 = sshll.u32 (!%p267_p0), %s1420_s10, 5 }
  0x2c   : > { %s275_s20 = scalar_lea.vmem (!%p267_p0), [#allocation2], %s1729_s17  ;;  %s992_s19 = sshll.u32 (!%p267_p0), %s1420_s10, 7 }
  0x2d   : > { %s1730_s29 = sshll.u32 (!%p267_p0), %s1274_s24, 1  ;;  %s1025_s30 = sshll.u32 (!%p267_p0), %s1278_s25, 5 }
  0x2e   : > { %s858_s9 = sadd.s32 (!%p267_p0), %s1025_s30, %s1730_s29  ;;  %s1294_s15 = smov (!%p267_p0), [#allocation5]  }
  0x2f   : > { %s1026_s13 = sshll.u32 (!%p267_p0), %s858_s9, 7 }
  0x30   : > { %v1292_v4 = vmov 0.0   ;;  %v1293_v5 = vmov 0   ;;  %v327_v6 = vld [vmem:[%s1724_s2 + $0x28] sm:$0xff]  ;;  %v1430_v7 = vld [vmem:[%s275_s20 + $0x18] sm:$0xff]  ;;  %v1432_v8 = vld [vmem:[%s275_s20 + $0x10] sm:$0xff]  ;;  %vm370_vm0 = vcmask 130048  }
  0x31   : > { %459 = vmatprep.mubr.f32.mxu0 %v1292_v4  ;;  %743 = vmatprep.mubr.f32.mxu1 %v1292_v4  ;;  %v1434_v9 = vld [vmem:[%s275_s20 + $0x8] sm:$0xff]  ;;  %v1437_v10 = vld [vmem:[%s275_s20] sm:$0xff]  ;;  %v329_v11 = vld [vmem:[%s1724_s2 + $0x38] sm:$0xff]  ;;  %vm642_vm1 = vcmask 261120   ;;  %s1592_s20 = scalar_lea.vmem [#allocation5], %s992_s19  ;;  %s1617_s19 = scalar_lea.hbm %s1728_s6, %s1026_s13 }
  0x32   : > { %1119 = vset.pattern.permute.xlu1 %v1293_v5  ;;  %1118 = vset.pattern.permute.xlu0 %v1293_v5  ;;  %v326_v12 = vld [vmem:[%s1724_s2 + $0x20] sm:$0xff]  ;;  %v328_v14 = vld [vmem:[%s1724_s2 + $0x30] sm:$0xff]  ;;  %v315_v16 = vld [vmem:[%s1737_s1 + $0x8] sm:$0xff]  ;;  %s861_s14 = sshll.u32 %s1592_s20, 4  ;;  %s1172_s13 = sshll.u32 %s1294_s15, 4  ;;  %s1619_s14 = int_to_ptr.vmem [resolvable:$true] %s861_s14  ;;  %s1173_s13 = int_to_ptr.vmem [resolvable:$false] %s1172_s13 }
  0x33   : > { %357 = vperm.xlu1 %1119, %v327_v6   ;;  %423 = vmatprep.subr.mxu0 %v1430_v7  ;;  %v314_v13 = vld [vmem:[%s1737_s1] sm:$0xff]  ;;  %v324_v15 = vld [vmem:[%s1724_s2 + $0x10] sm:$0xff]  ;;  %v325_v17 = vld [vmem:[%s1724_s2 + $0x18] sm:$0xff]  ;;  %s1168_s17 = scalar_lea.vmem %s1619_s14, 2048  ;;  %s1174_s18 = scalar_lea.vmem %s1173_s13, 4096 }
  0x34   : > { %424 = vmatpush1.msra.mxu0 %v1432_v8  ;;  %367 = vperm.xlu0 %1118, %v329_v11   ;;  %v322_v18 = vld [vmem:[%s1724_s2] sm:$0xff]  ;;  %v316_v19 = vld [vmem:[%s1737_s1 + $0x10] sm:$0xff]  ;;  %v323_v20 = vld [vmem:[%s1724_s2 + $0x8] sm:$0xff]  ;;  %p1169_p1 = scmp.ne.s32.totalorder %s1619_s14, %s1168_s17  ;;  %p1175_p4 = scmp.lt.s32.totalorder %s1619_s14, %s1173_s13 }
  0x35   : > { %425 = vmatprep.subr.mxu0 %v1434_v9  ;;  %v591_v21 = vld [vmem:[%s1726_s4 + $0x48] sm:$0xff]  ;;  %v317_v22 = vld [vmem:[%s1737_s1 + $0x18] sm:$0xff]  ;;  %v590_v23 = vld [vmem:[%s1726_s4 + $0x40] sm:$0xff]  ;;  %p1176_p5 = scmp.lt.s32.totalorder %s1174_s18, %s1168_s17 }
  0x36   : > { %426 = vmatpush1.msra.mxu0 %v1437_v10  ;;  %v583_v24 = vld [vmem:[%s1726_s4 + $0x8] sm:$0xff]  ;;  %v318_v25 = vld [vmem:[%s1737_s1 + $0x20] sm:$0xff]  ;;  %v585_v27 = vld [vmem:[%s1726_s4 + $0x18] sm:$0xff]  ;;  %p1170_p2 = pnand %p1169_p1, %p1394_p8 }
  0x37   : > { %352 = vperm.xlu1 %1119, %v326_v12   ;;  %993 = vmatmul.mubr.msk.f32.vlgmr.msra.gmra.mxu0 %vm370_vm0, %v314_v13  ;;  %v582_v26 = vld [vmem:[%s1726_s4] sm:$0xff]  ;;  %v319_v28 = vld [vmem:[%s1737_s1 + $0x28] sm:$0xff]  ;;  %v584_v29 = vld [vmem:[%s1726_s4 + $0x10] sm:$0xff]  ;;  %p1177_p6 = por %p1176_p5, %p1175_p4 }
  0x38   : > { %465 = vmatprep.mubr.f32.mxu0 %v1292_v4  ;;  %362 = vperm.xlu0 %1118, %v328_v14   ;;  %v587_v30 = vld [vmem:[%s1726_s4 + $0x28] sm:$0xff]  ;;  %v320_v31 = vld [vmem:[%s1737_s1 + $0x30] sm:$0xff]  ;;  %v586_v32 = vld [vmem:[%s1726_s4 + $0x20] sm:$0xff]  ;;  %p1171_p3 = pneg %p1170_p2 }
  0x39   : > { %v589_v33 = vld [vmem:[%s1726_s4 + $0x38] sm:$0xff]  ;;  %v588_v35 = vld [vmem:[%s1726_s4 + $0x30] sm:$0xff] }
  0x3a   : > { %v321_v34 = vld [vmem:[%s1737_s1 + $0x38] sm:$0xff]  ;;  %p1178_p7 = pnand %p1177_p6, %p1171_p3 }
  0x3b   : > { %342 = vperm.xlu1 %1119, %v324_v15   ;;  %994 = vmatmul.mubr.msk.f32.gmra.mxu0 %vm370_vm0, %v315_v16 }
  0x3c   : > { %471 = vmatprep.mubr.f32.mxu0 %v1292_v4  ;;  %347 = vperm.xlu0 %1118, %v325_v17  }
  0x3f   : > { %332 = vperm.xlu1 %1119, %v322_v18   ;;  %995 = vmatmul.mubr.msk.f32.gmra.mxu0 %vm370_vm0, %v316_v19 }
  0x40   : > { %477 = vmatprep.mubr.f32.mxu0 %v1292_v4  ;;  %337 = vperm.xlu0 %1118, %v323_v20  }
  0x43   : > { %639 = vperm.xlu1 %1119, %v591_v21   ;;  %996 = vmatmul.mubr.msk.f32.gmra.mxu0 %vm370_vm0, %v317_v22 }
  0x44   : > { %483 = vmatprep.mubr.f32.mxu0 %v1292_v4  ;;  %634 = vperm.xlu0 %1118, %v590_v23  }
  0x47   : > { %599 = vperm.xlu1 %1119, %v583_v24   ;;  %997 = vmatmul.mubr.msk.f32.gmra.mxu0 %vm370_vm0, %v318_v25 }
  0x48   : > { %489 = vmatprep.mubr.f32.mxu0 %v1292_v4  ;;  %594 = vperm.xlu0 %1118, %v582_v26  }
  0x4b   : > { %609 = vperm.xlu1 %1119, %v585_v27   ;;  %998 = vmatmul.mubr.msk.f32.gmra.mxu0 %vm370_vm0, %v319_v28 }
  0x4c   : > { %495 = vmatprep.mubr.f32.mxu0 %v1292_v4  ;;  %604 = vperm.xlu0 %1118, %v584_v29  }
  0x4f   : > { %619 = vperm.xlu1 %1119, %v587_v30   ;;  %999 = vmatmul.mubr.msk.f32.gmra.mxu0 %vm370_vm0, %v320_v31 }
  0x50   : > { %501 = vmatprep.mubr.f32.mxu0 %v1292_v4  ;;  %614 = vperm.xlu0 %1118, %v586_v32  }
  0x53   : > { %629 = vperm.xlu1 %1119, %v589_v33   ;;  %1000 = vmatmul.mubr.msk.f32.gmra.mxu0 %vm370_vm0, %v321_v34 }
  0x54   : > { %624 = vperm.xlu0 %1118, %v588_v35   ;;  %737 = vmatprep.mubr.f32.mxu0 %v1292_v4 }
  0xae   : > { %v358_v43 = vpop.permute.xlu1 %357 }
  0xaf   : > { %v368_v46 = vpop.permute.xlu0 %367 }
  0xb2   : > { %v353_v48 = vpop.permute.xlu1 %352 }
  0xb3   : > { %v363_v53 = vpop.permute.xlu0 %362 }
  0xb6   : > { %v343_v16 = vpop.permute.xlu1 %342 }
  0xb7   : > { %v348_v2 = vpop.permute.xlu0 %347 }
  0xbb   : > { %v338_v14 = vpop.permute.xlu0 %337 }
  0xf7   : > { %v1533_v36 = vpop.f32.mrf.mxu0 }
  0xf9   : > { %v1535_v37 = vpop.f32.mrf.mxu0 }
  0xfb   : > { %v467_v38 = vpop.f32.mrf.mxu0 }
  0xfc   : > { %v468_v15 = vadd.f32 %v467_v38, %v338_v14  ;;  %v333_v38 = vpop.permute.xlu1 %332 }
  0xfd   : > { %v469_v39 = vpop.f32.mrf.mxu0 }
  0xfe   : > { %v470_v17 = vadd.f32 %v469_v39, %v338_v14  ;;  %v580_v14 = vld [vmem:[%s1725_s3 + $0x40] sm:$0xff] }
  0xff   : > { %v473_v40 = vpop.f32.mrf.mxu0 }
 0x100   : > { %v474_v18 = vadd.f32 %v473_v40, %v343_v16 }
 0x101   : > { %v475_v41 = vpop.f32.mrf.mxu0 }
 0x102   : > { %v476_v20 = vadd.f32 %v475_v41, %v343_v16  ;;  %v464_v41 = vadd.f32 %v1535_v37, %v333_v38  ;;  %v1587_v16 = vpop.permute.xlu0 %634 }
 0x103   : > { %v479_v42 = vpop.f32.mrf.mxu0 }
 0x104   : > { %v480_v22 = vadd.f32 %v479_v42, %v348_v2  ;;  %v462_v42 = vadd.f32 %v1533_v36, %v333_v38 }
 0x105   : > { %v481_v44 = vpop.f32.mrf.mxu0 }
 0x106   : > { %v482_v24 = vadd.f32 %v481_v44, %v348_v2  ;;  %v573_v2 = vld [vmem:[%s1725_s3 + $0x8] sm:$0xff] }
 0x107   : > { %v485_v45 = vpop.f32.mrf.mxu0 }
 0x108   : > { %v486_v61 = vadd.f32 %v485_v45, %v353_v48 }
 0x109   : > { %v487_v47 = vpop.f32.mrf.mxu0 }
 0x10a   : > { %v488_v50 = vadd.f32 %v487_v47, %v353_v48  ;;  %v1001_v12 = vmul.f32 -1.442695, %v486_v61 }
 0x10b   : > { %v491_v49 = vpop.f32.mrf.mxu0 }
 0x10c   : > { %v1002_v55 = vmul.f32 -1.442695, %v488_v50  ;;  %v492_v57 = vadd.f32 %v491_v49, %v358_v43 }
 0x10d   : > { %v493_v51 = vpop.f32.mrf.mxu0 }
 0x10e   : > { %v494_v52 = vadd.f32 %v493_v51, %v358_v43  ;;  %1120 = vpow2.f32 %v1002_v55  ;;  %v1003_v3 = vmul.f32 -1.442695, %v492_v57 }
 0x10f   : > { %v497_v54 = vpop.f32.mrf.mxu0 }
 0x110   : > { %v498_v56 = vadd.f32 %v497_v54, %v363_v53  ;;  %v1004_v58 = vmul.f32 -1.442695, %v494_v52 }
 0x111   : > { %v499_v59 = vpop.f32.mrf.mxu0 }
 0x112   : > { %v500_v60 = vadd.f32 %v499_v59, %v363_v53  ;;  %v1005_v62 = vmul.f32 -1.442695, %v498_v56  ;;  %1122 = vpow2.f32 %v1004_v58 }
 0x113   : > { %v503_v63 = vpop.f32.mrf.mxu0 }
 0x114   : > { %v1006_v0 = vmul.f32 -1.442695, %v500_v60  ;;  %v504_v1 = vadd.f32 %v503_v63, %v368_v46 }
 0x115   : > { %v505_v5 = vpop.f32.mrf.mxu0 }
 0x116   : > { %1124 = vpow2.f32 %v1006_v0  ;;  %v1007_v6 = vmul.f32 -1.442695, %v504_v1  ;;  %v506_v11 = vadd.f32 %v505_v5, %v368_v46  ;;  %v572_v1 = vld [vmem:[%s1725_s3] sm:$0xff]  ;;  %v575_v5 = vld [vmem:[%s1725_s3 + $0x18] sm:$0xff] }
 0x117   : > { %1126 = vpow2.f32 %v1005_v62 }
 0x118   : > { %1128 = vpow2.f32 %v1007_v6  ;;  %v1008_v13 = vmul.f32 -1.442695, %v506_v11  ;;  %v576_v6 = vld [vmem:[%s1725_s3 + $0x20] sm:$0xff]  ;;  %v577_v11 = vld [vmem:[%s1725_s3 + $0x28] sm:$0xff] }
 0x119   : > { %1130 = vpow2.f32 %v1003_v3  ;;  %v574_v3 = vld [vmem:[%s1725_s3 + $0x10] sm:$0xff] }
 0x11a   : > { %1132 = vpow2.f32 %v1008_v13  ;;  %v579_v13 = vld [vmem:[%s1725_s3 + $0x38] sm:$0xff] }
 0x11b   : > { %1134 = vpow2.f32 %v1001_v12  ;;  %v1121_v19 = vpop.eup %1120  ;;  %v578_v12 = vld [vmem:[%s1725_s3 + $0x30] sm:$0xff] }
 0x11c   : > { %1136 = vtanh.f32 %v468_v15  ;;  %v541_v39 = vadd.f32 1.0, %v1121_v19  ;;  %v581_v15 = vld [vmem:[%s1725_s3 + $0x48] sm:$0xff] }
 0x11d   : > { %1138 = vtanh.f32 %v470_v17  ;;  %v1589_v17 = vpop.permute.xlu1 %639 }
 0x11e   : > { %1140 = vtanh.f32 %v474_v18  ;;  %v595_v18 = vpop.permute.xlu0 %594 }
 0x11f   : > { %v1123_v21 = vpop.eup %1122  ;;  %1142 = vtanh.f32 %v476_v20 }
 0x120   : > { %1144 = vtanh.f32 %v480_v22  ;;  %v543_v33 = vadd.f32 1.0, %v1123_v21 }
 0x121   : > { %1146 = vtanh.f32 %v482_v24  ;;  %v600_v19 = vpop.permute.xlu1 %599 }
 0x123   : > { %v1125_v23 = vpop.eup %1124 }
 0x124   : > { %v1127_v25 = vpop.eup %1126  ;;  %v545_v26 = vadd.f32 1.0, %v1125_v23 }
 0x125   : > { %v1129_v27 = vpop.eup %1128  ;;  %v544_v31 = vadd.f32 1.0, %v1127_v25 }
 0x126   : > { %v1131_v28 = vpop.eup %1130  ;;  %v546_v29 = vadd.f32 1.0, %v1129_v27  ;;  %1148 = vrcp.f32 %v545_v26  ;;  %v605_v27 = vpop.permute.xlu0 %604 }
 0x127   : > { %v1133_v30 = vpop.eup %1132  ;;  %v542_v35 = vadd.f32 1.0, %v1131_v28 }
 0x128   : > { %v1135_v32 = vpop.eup %1134  ;;  %v547_v34 = vadd.f32 1.0, %v1133_v30  ;;  %1150 = vrcp.f32 %v546_v29 }
 0x129   : > { %v540_v40 = vadd.f32 1.0, %v1135_v32  ;;  %v1137_v43 = vpop.eup %1136  ;;  %v610_v32 = vpop.permute.xlu1 %609 }
 0x12a   : > { %1152 = vrcp.f32 %v547_v34  ;;  %v1139_v44 = vpop.eup %1138 }
 0x12b   : > { %1154 = vrcp.f32 %v544_v31  ;;  %v1141_v45 = vpop.eup %1140 }
 0x12c   : > { %1156 = vrcp.f32 %v543_v33  ;;  %v1143_v46 = vpop.eup %1142 }
 0x12d   : > { %1158 = vrcp.f32 %v542_v35  ;;  %v1145_v47 = vpop.eup %1144 }
 0x12e   : > { %1160 = vrcp.f32 %v541_v39  ;;  %v1147_v48 = vpop.eup %1146  ;;  %v615_v39 = vpop.permute.xlu0 %614 }
 0x12f   : > { %1162 = vrcp.f32 %v540_v40 }
 0x130   : > { %1164 = vtanh.f32 %v464_v41 }
 0x131   : > { %1166 = vtanh.f32 %v462_v42 }
 0x133   : > { %v1149_v49 = vpop.eup %1148 }
 0x134   : > { %v569_v36 = vmul.f32 %v1149_v49, %v1143_v46  ;;  %v625_v49 = vpop.permute.xlu0 %624 }
 0x135   : > { %v1151_v50 = vpop.eup %1150 }
 0x136   : > { %v570_v54 = vmul.f32 %v1151_v50, %v1145_v47 }
 0x137   : > { %v1153_v51 = vpop.eup %1152 }
 0x138   : > { %v1155_v52 = vpop.eup %1154  ;;  %v571_v53 = vmul.f32 %v1153_v51, %v1147_v48 }
 0x139   : > { %v1157_v37 = vpop.eup %1156  ;;  %v568_v57 = vmul.f32 %v1155_v52, %v1141_v45 }
 0x13a   : > { %v1159_v55 = vpop.eup %1158  ;;  %697 = vmatprep.subr.mxu0 %v571_v53  ;;  %1029 = vmatprep.subr.mxu1 %v571_v53  ;;  %v567_v59 = vmul.f32 %v1157_v37, %v1139_v44  ;;  %v620_v44 = vpop.permute.xlu1 %619 }
 0x13b   : > { %v1161_v56 = vpop.eup %1160  ;;  %698 = vmatpush1.msra.mxu0 %v570_v54  ;;  %1033 = vmatpush1.msra.mxu1 %v570_v54  ;;  %v566_v61 = vmul.f32 %v1159_v55, %v1137_v43 }
 0x13c   : > { %v1163_v58 = vpop.eup %1162  ;;  %699 = vmatprep.subr.mxu0 %v569_v36  ;;  %1030 = vmatprep.subr.mxu1 %v569_v36 }
 0x13d   : > { %v1165_v60 = vpop.eup %1164  ;;  %700 = vmatpush1.msra.mxu0 %v568_v57  ;;  %1034 = vmatpush1.msra.mxu1 %v568_v57 }
 0x13e   : > { %v1167_v62 = vpop.eup %1166  ;;  %701 = vmatprep.subr.mxu0 %v567_v59  ;;  %1031 = vmatprep.subr.mxu1 %v567_v59  ;;  %v565_v63 = vmul.f32 %v1165_v60, %v1161_v56  ;;  %v630_v37 = vpop.permute.xlu1 %629 }
 0x13f   : > { %702 = vmatpush1.msra.mxu0 %v566_v61  ;;  %1035 = vmatpush1.msra.mxu1 %v566_v61  ;;  %v564_v0 = vmul.f32 %v1167_v62, %v1163_v58 }
 0x140   : > { %703 = vmatprep.subr.mxu0 %v565_v63  ;;  %1032 = vmatprep.subr.mxu1 %v565_v63 }
 0x141   : > { %704 = vmatpush1.msra.mxu0 %v564_v0  ;;  %1036 = vmatpush1.msra.mxu1 %v564_v0 }
 0x142   : > { %1009 = vmatmul.mubr.msk.f32.vlgmr.msra.gmra.mxu0 %vm642_vm1, %v572_v1  ;;  %1010 = vmatmul.mubr.msk.f32.vlgmr.msra.gmra.mxu1 %vm642_vm1, %v573_v2 }
 0x143   : > { %749 = vmatprep.mubr.f32.mxu1 %v1292_v4 }
 0x146   : > { %1011 = vmatmul.mubr.msk.f32.gmra.mxu1 %vm642_vm1, %v574_v3 }
 0x147   : > { %755 = vmatprep.mubr.f32.mxu1 %v1292_v4 }
 0x14a   : > { %1012 = vmatmul.mubr.msk.f32.gmra.mxu1 %vm642_vm1, %v575_v5 }
 0x14b   : > { %761 = vmatprep.mubr.f32.mxu1 %v1292_v4 }
 0x14e   : > { %1013 = vmatmul.mubr.msk.f32.gmra.mxu1 %vm642_vm1, %v576_v6 }
 0x14f   : > { %767 = vmatprep.mubr.f32.mxu1 %v1292_v4 }
 0x152   : > { %1014 = vmatmul.mubr.msk.f32.gmra.mxu1 %vm642_vm1, %v577_v11 }
 0x153   : > { %773 = vmatprep.mubr.f32.mxu1 %v1292_v4 }
 0x156   : > { %1015 = vmatmul.mubr.msk.f32.gmra.mxu1 %vm642_vm1, %v578_v12 }
 0x157   : > { %779 = vmatprep.mubr.f32.mxu1 %v1292_v4 }
 0x15a   : > { %1016 = vmatmul.mubr.msk.f32.gmra.mxu1 %vm642_vm1, %v579_v13 }
 0x15b   : > { %785 = vmatprep.mubr.f32.mxu1 %v1292_v4 }
 0x15e   : > { %1017 = vmatmul.mubr.msk.f32.gmra.mxu1 %vm642_vm1, %v580_v14 }
 0x15f   : > { %791 = vmatprep.mubr.f32.mxu1 %v1292_v4 }
 0x162   : > { %1018 = vmatmul.mubr.msk.f32.gmra.mxu1 %vm642_vm1, %v581_v15 }
 0x202   : > { %v739_v20 = vpop.f32.mrf.mxu0  ;;  %v745_v21 = vpop.f32.mrf.mxu1 }
 0x203   : > { %v740_v22 = vadd.f32 %v739_v20, %v595_v18  ;;  %v746_v23 = vadd.f32 %v745_v21, %v600_v19 }
 0x204   : > { %v741_v24 = vpop.f32.mrf.mxu0  ;;  %v747_v25 = vpop.f32.mrf.mxu1 }
 0x205   : > { %798 = vst [vmem:[%s1592_s20] sm:$0xff] %v740_v22  ;;  %800 = vst [vmem:[%s1592_s20 + $0x10] sm:$0xff] %v746_v23  ;;  %v742_v4 = vadd.f32 %v741_v24, %v595_v18  ;;  %v748_v26 = vadd.f32 %v747_v25, %v600_v19 }
 0x206   : > { %v751_v28 = vpop.f32.mrf.mxu1 }
 0x207   : > { %799 = vst [vmem:[%s1592_s20 + $0x8] sm:$0xff] %v742_v4  ;;  %801 = vst [vmem:[%s1592_s20 + $0x18] sm:$0xff] %v748_v26  ;;  %v752_v29 = vadd.f32 %v751_v28, %v605_v27 }
 0x208   : > { %v753_v30 = vpop.f32.mrf.mxu1 }
 0x209   : > { %802 = vst [vmem:[%s1592_s20 + $0x20] sm:$0xff] %v752_v29  ;;  %v754_v31 = vadd.f32 %v753_v30, %v605_v27 }
 0x20a   : > { %v757_v33 = vpop.f32.mrf.mxu1 }
 0x20b   : > { %803 = vst [vmem:[%s1592_s20 + $0x28] sm:$0xff] %v754_v31  ;;  %v758_v34 = vadd.f32 %v757_v33, %v610_v32 }
 0x20c   : > { %v759_v35 = vpop.f32.mrf.mxu1 }
 0x20d   : > { %804 = vst [vmem:[%s1592_s20 + $0x30] sm:$0xff] %v758_v34  ;;  %v760_v38 = vadd.f32 %v759_v35, %v610_v32 }
 0x20e   : > { %v763_v40 = vpop.f32.mrf.mxu1 }
 0x20f   : > { %805 = vst [vmem:[%s1592_s20 + $0x38] sm:$0xff] %v760_v38  ;;  %v764_v41 = vadd.f32 %v763_v40, %v615_v39 }
 0x210   : > { %v765_v42 = vpop.f32.mrf.mxu1 }
 0x211   : > { %806 = vst [vmem:[%s1592_s20 + $0x40] sm:$0xff] %v764_v41  ;;  %v766_v43 = vadd.f32 %v765_v42, %v615_v39 }
 0x212   : > { %v769_v45 = vpop.f32.mrf.mxu1 }
 0x213   : > { %807 = vst [vmem:[%s1592_s20 + $0x48] sm:$0xff] %v766_v43  ;;  %v770_v46 = vadd.f32 %v769_v45, %v620_v44 }
 0x214   : > { %v771_v47 = vpop.f32.mrf.mxu1 }
 0x215   : > { %808 = vst [vmem:[%s1592_s20 + $0x50] sm:$0xff] %v770_v46  ;;  %v772_v48 = vadd.f32 %v771_v47, %v620_v44 }
 0x216   : > { %v775_v50 = vpop.f32.mrf.mxu1 }
 0x217   : > { %809 = vst [vmem:[%s1592_s20 + $0x58] sm:$0xff] %v772_v48  ;;  %v776_v51 = vadd.f32 %v775_v50, %v625_v49 }
 0x218   : > { %v777_v52 = vpop.f32.mrf.mxu1 }
 0x219   : > { %810 = vst [vmem:[%s1592_s20 + $0x60] sm:$0xff] %v776_v51  ;;  %v778_v53 = vadd.f32 %v777_v52, %v625_v49 }
 0x21a   : > { %v781_v54 = vpop.f32.mrf.mxu1 }
 0x21b   : > { %811 = vst [vmem:[%s1592_s20 + $0x68] sm:$0xff] %v778_v53  ;;  %v782_v55 = vadd.f32 %v781_v54, %v630_v37 }
 0x21c   : > { %v783_v36 = vpop.f32.mrf.mxu1 }
 0x21d   : > { %812 = vst [vmem:[%s1592_s20 + $0x70] sm:$0xff] %v782_v55  ;;  %v784_v56 = vadd.f32 %v783_v36, %v630_v37 }
 0x21e   : > { %v787_v57 = vpop.f32.mrf.mxu1 }
 0x21f   : > { %813 = vst [vmem:[%s1592_s20 + $0x78] sm:$0xff] %v784_v56  ;;  %v788_v58 = vadd.f32 %v787_v57, %v1587_v16 }
 0x220   : > { %v789_v59 = vpop.f32.mrf.mxu1 }
 0x221   : > { %1181 = shalt.err (!%p1178_p7)
}
 0x222   : > { %s1182_s20 = scalar_lea.hbm %s1617_s19, 2048  ;;  %s1186_s15 = scalar_lea.hbm %s1728_s6, 8192 }
 0x223   : > { %p1183_p10 = scmp.ne.s32.totalorder %s1617_s19, %s1182_s20  ;;  %p1187_p13 = scmp.lt.s32.totalorder %s1617_s19, %s1728_s6 }
 0x224   : > { %p1188_p0 = scmp.lt.s32.totalorder %s1186_s15, %s1182_s20 }
 0x225   : > { %p1184_p11 = pnand %p1183_p10, %p1394_p8 }
 0x226   : > { %p1189_p1 = por %p1188_p0, %p1187_p13 }
 0x227   : > { %p1185_p12 = pneg %p1184_p11 }
 0x229   : > { %p1190_p2 = pnand %p1189_p1, %p1185_p12 }
 0x22b   : > { %1193 = shalt.err (!%p1190_p2)
}
 0x22c   : > { %s1295_s17 = smov 256   ;;  %s1296_s13 = smov 512   ;;  %v814_v60 = vadd.f32 %v788_v58, %v1437_v10  ;;  %v790_v61 = vadd.f32 %v789_v59, %v1587_v16  ;;  %v793_v62 = vpop.f32.mrf.mxu1 }
 0x22d   : > { %s1297_s18 = smov 16   ;;  %s1738_s0 = scalar_lea.sflag [#allocation6], %s1420_s10  ;;  %v794_v0 = vadd.f32 %v793_v62, %v1589_v17 }
 0x22e   : > { %1038 = dma.vmem_to_hbm [thread:$0]  (%p1394_p8), %s1619_s14, 2048, %s1617_s19, %s1738_s0, %s1295_s17, %s1296_s13, %s1297_s18   ;;  %v815_v63 = vadd.f32 %v790_v61, %v1434_v9  ;;  %v795_v1 = vpop.f32.mrf.mxu1 }
 0x22f   : > { %s1739_s29 = sshll.u32 %s1274_s24, 1  ;;  %s1740_s30 = sshll.u32 %s1278_s25, 3  ;;  %v816_v10 = vadd.f32 %v794_v0, %v1432_v8  ;;  %v796_v2 = vadd.f32 %v795_v1, %v1589_v17 }
 0x230   : > { %s840_s9 = sadd.s32 %s1740_s30, %s1739_s29  ;;  %s1741_s20 = sshll.u32 %s1420_s10, 5 }
 0x231   : > { %s299_s15 = scalar_lea.vmem [#allocation3], %s1741_s20  ;;  %s1023_s14 = sshll.u32 %s840_s9, 7  ;;  %v817_v3 = vadd.f32 %v796_v2, %v1430_v7 }
 0x232   : > { %818 = vst [vmem:[%s299_s15] sm:$0xff] %v814_v60  ;;  %s843_s1 = sshll.u32 %s299_s15, 4  ;;  %819 = vst [vmem:[%s299_s15 + $0x8] sm:$0xff] %v815_v63  ;;  %s1668_s19 = scalar_lea.hbm %s1727_s5, %s1023_s14  ;;  %s1662_s1 = int_to_ptr.vmem [resolvable:$true] %s843_s1 }
 0x233   : > { %820 = vst [vmem:[%s299_s15 + $0x10] sm:$0xff] %v816_v10  ;;  %821 = vst [vmem:[%s299_s15 + $0x18] sm:$0xff] %v817_v3  ;;  %s823_s0 = scalar_lea.sflag [#allocation4], %s1420_s10  ;;  %s1194_s29 = scalar_lea.vmem %s1662_s1, 512 }
 0x234   : > { %p1195_p3 = scmp.ne.s32.totalorder %s1662_s1, %s1194_s29  ;;  %s1298_s30 = smov [#allocation3]  }
 0x235   : > { %s1198_s9 = sshll.u32 %s1298_s30, 4  ;;  %s1199_s9 = int_to_ptr.vmem [resolvable:$false] %s1198_s9 }
 0x236   : > { %p1196_p4 = pnand %p1195_p3, %p1394_p8  ;;  %s1200_s20 = scalar_lea.vmem %s1199_s9, 1024 }
 0x237   : > { %p1201_p6 = scmp.lt.s32.totalorder %s1662_s1, %s1199_s9  ;;  %p1202_p7 = scmp.lt.s32.totalorder %s1200_s20, %s1194_s29 }
 0x238   : > { %p1197_p5 = pneg %p1196_p4 }
 0x239   : > { %p1203_p10 = por %p1202_p7, %p1201_p6 }
 0x23b   : > { %p1204_p11 = pnand %p1203_p10, %p1197_p5 }
 0x23d   : > { %1207 = shalt.err (!%p1204_p11)
}
 0x23e   : > { %s1208_s15 = scalar_lea.hbm %s1668_s19, 512  ;;  %s1212_s24 = scalar_lea.hbm %s1727_s5, 2048 }
 0x23f   : > { %p1209_p12 = scmp.ne.s32.totalorder %s1668_s19, %s1208_s15  ;;  %p1213_p1 = scmp.lt.s32.totalorder %s1668_s19, %s1727_s5 }
 0x240   : > { %p1214_p2 = scmp.lt.s32.totalorder %s1212_s24, %s1208_s15 }
 0x241   : > { %p1210_p13 = pnand %p1209_p12, %p1394_p8 }
 0x242   : > { %p1215_p3 = por %p1214_p2, %p1213_p1 }
 0x243   : > { %p1211_p0 = pneg %p1210_p13 }
 0x245   : > { %p1216_p4 = pnand %p1215_p3, %p1211_p0 }
 0x247   : > { %1219 = shalt.err (!%p1216_p4)
}
 0x248   : > { %1037 = dma.vmem_to_hbm [thread:$0]  (%p1394_p8), %s1662_s1, 512, %s1668_s19, %s823_s0, %s1295_s17, %s1296_s13, %s1297_s18  }
 0x249 PF: > { %p1048_p5 = scmp.ge.s32.totalorder %s1290_s28, 2  ;;  %s876_s29 = sand.u32 1, %s1262_s21  }
 0x24a   : > { %s877_s9 = scalar_lea.sflag [#allocation4], %s876_s29 }
 0x24b   : > { %p1042_p6 = pnand %p1048_p5, %p1398_p9 }
 0x24d   : > { %p1043_p7 = pneg %p1042_p6 }
 0x24f   : > { %1253 = dma.done.wait (%p1043_p7), %s877_s9, 512  }
 0x250   : > { %1255 = vsyncadd (%p1043_p7), %s877_s9, 4294966784  ;;  %s886_s20 = scalar_lea.sflag [#allocation6], %s876_s29 }
 0x251   : > { %1257 = dma.done.wait (%p1043_p7), %s886_s20, 2048  }
 0x252   : > { %1259 = vsyncadd (%p1043_p7), %s886_s20, 4294965248  ;;  %s23_s28 = sadd.s32 1, %s1290_s28   ;;  %s1742_s21 = smov %s1266_s22 }
 0x253   : > { %p20_p10 = scmp.ge.s32.totalorder %s23_s28, 6   ;;  %s1743_s22 = smov %s1270_s23 }
 0x254   : > { %s1744_s23 = smov %s1406_s16  ;;  %s1745_s24 = smov %s1282_s26 }
 0x255   : > { %s1746_s25 = smov %s1286_s27  ;;  %s1747_s26 = smov %s1750_s7 }
 0x256   : > { %s1748_s27 = smov %s1754_s8  ;;  %22 = sbr.rel (!%p20_p10) target bundleno = 10 (0xa), region = 120 }
 0x25b   :  { %891 = vsyncpa [#allocation4], 1 }
 0x25c   :  { %893 = vsyncpa [#allocation4 + $0x1], 1 }
 0x25d   :  { %894 = vsyncpa [#allocation6], 1 }
 0x25e   :  { %896 = vsyncpa [#allocation6 + $0x1], 1 }

</bundles_post_ra>
